<compile_context>
chip_gen: v5e
topology: v5e:2x2
jax: 0.10.0
libtpu: 0.0.40
codegen_flags: <defaults>
</compile_context>

<pallas_src>
import functools

import jax
import jax.numpy as jnp
from jax.experimental import pallas as pl
from jax.experimental.pallas import tpu as pltpu

LANE = 128
SUBLANE = 8


def mlp_kernel(x_ref, w1_ref, b1_ref, w2_ref, b2_ref, w3_ref, b3_ref, o_ref):
    # One batch tile per grid step: three MXU matmuls + VPU bias/ReLU. All
    # operands are single lane-dense VMEM blocks; weights/biases are VMEM
    # resident across grid steps (constant index_maps), so only the x tile
    # DMA pipelines with compute.
    x = x_ref[...]
    h1 = jnp.dot(x, w1_ref[...], preferred_element_type=jnp.float32) + b1_ref[...]
    h1 = jnp.maximum(h1, 0.0)                      # ReLU (f32 elementwise)
    h2 = jnp.dot(h1, w2_ref[...], preferred_element_type=jnp.float32) + b2_ref[...]
    h2 = jnp.maximum(h2, 0.0)                      # ReLU
    out = jnp.dot(h2, w3_ref[...], preferred_element_type=jnp.float32) + b3_ref[...]
    o_ref[...] = out.astype(o_ref.dtype)


def _pad_to(a, shape):
    return jnp.pad(a, [(0, s - d) for d, s in zip(a.shape, shape)])


def prepare_params(params):
    """One-time: pad weights/biases to lane-dense shapes and cast to f32.

    Zero padding is exact for this MLP (ReLU(0)=0; zero weight rows/cols and
    zero bias columns contribute nothing).  Keeps the per-call forward path
    free of pad/cast XLA ops.
    """
    w1, b1 = params["w1"], params["b1"]
    w2, b2 = params["w2"], params["b2"]
    w3, b3 = params["w3"], params["b3"]
    IN, H = w1.shape
    C = w3.shape[1]
    HP = pl.cdiv(H, LANE) * LANE
    CP = pl.cdiv(C, LANE) * LANE
    return {
        "w1": _pad_to(w1.astype(jnp.float32), (IN, HP)),
        "b1": _pad_to(b1.reshape(1, -1).astype(jnp.float32), (1, HP)),
        "w2": _pad_to(w2.astype(jnp.float32), (HP, HP)),
        "b2": _pad_to(b2.reshape(1, -1).astype(jnp.float32), (1, HP)),
        "w3": _pad_to(w3.astype(jnp.float32), (HP, CP)),
        "b3": _pad_to(b3.reshape(1, -1).astype(jnp.float32), (1, CP)),
    }


def _pick_tb(B):
    """Batch tile: large (amortize ~0.35us/step grid overhead), lane/sublane
    aligned, but keep >= 2 grid steps when B allows so the 'parallel' batch
    axis can shard across both v7x TensorCores."""
    if B <= LANE:
        return pl.cdiv(B, SUBLANE) * SUBLANE        # single step, sublane aligned
    tb = pl.cdiv(B, 2 * LANE) * LANE                # ~2 steps, 128-aligned (fills v6e MXU)
    return min(tb, 2048)                            # VMEM stays tiny either way


@functools.partial(jax.jit, static_argnames=("num_classes", "tb"))
def digit_classifier_forward(x, padded_params, num_classes, tb=None):
    """x: (B, input_size) f32. padded_params: output of prepare_params()."""
    p = padded_params
    w1, b1, w2, b2, w3, b3 = p["w1"], p["b1"], p["w2"], p["b2"], p["w3"], p["b3"]
    B, IN = x.shape
    HP = w1.shape[1]
    CP = w3.shape[1]

    if tb is None:
        tb = _pick_tb(B)
    BP = pl.cdiv(B, tb) * tb

    x = x.astype(jnp.float32)
    if BP != B:                                     # only pad x when needed
        x = _pad_to(x, (BP, IN))

    grid = (BP // tb,)

    flops = 2 * BP * (IN * HP + HP * HP + HP * CP)
    bytes_accessed = 4 * (BP * IN + IN * HP + HP + HP * HP + HP
                          + HP * CP + CP + BP * CP)

    out_p = pl.pallas_call(
        mlp_kernel,
        out_shape=jax.ShapeDtypeStruct((BP, CP), jnp.float32),
        grid=grid,
        in_specs=[
            # x tile advances with the batch grid.
            pl.BlockSpec((tb, IN), lambda i: (i, 0)),
            # Weights / biases: constant index_map -> VMEM-resident across steps.
            pl.BlockSpec((IN, HP), lambda i: (0, 0)),
            pl.BlockSpec((1, HP), lambda i: (0, 0)),
            pl.BlockSpec((HP, HP), lambda i: (0, 0)),
            pl.BlockSpec((1, HP), lambda i: (0, 0)),
            pl.BlockSpec((HP, CP), lambda i: (0, 0)),
            pl.BlockSpec((1, CP), lambda i: (0, 0)),
        ],
        out_specs=pl.BlockSpec((tb, CP), lambda i: (i, 0)),
        compiler_params=pltpu.CompilerParams(
            dimension_semantics=("parallel",)),
        cost_estimate=pl.CostEstimate(
            flops=flops, transcendentals=0, bytes_accessed=bytes_accessed),
    )(x, w1, b1, w2, b2, w3, b3)

    # Slice back to the real batch / class count (padding is exactly zero).
    # TODO(synk): if a softmax/argmax consumer existed it could be fused here
    # to avoid writing back the 128-wide padded logits.
    return out_p[:B, :num_classes]


def init_params(key, input_size, hidden_size, num_classes):
    # Deterministic synthetic init (uniform like nn.Linear's default range).
    ks = jax.random.split(key, 6)

    def lin(kw, kb, fan_in, fan_out):
        bound = 1.0 / jnp.sqrt(fan_in)
        w = jax.random.uniform(kw, (fan_in, fan_out), jnp.float32, -bound, bound)
        b = jax.random.uniform(kb, (1, fan_out), jnp.float32, -bound, bound)
        return w, b

    w1, b1 = lin(ks[0], ks[1], input_size, hidden_size)
    w2, b2 = lin(ks[2], ks[3], hidden_size, hidden_size)
    w3, b3 = lin(ks[4], ks[5], hidden_size, num_classes)
    return {"w1": w1, "b1": b1, "w2": w2, "b2": b2, "w3": w3, "b3": b3}


def reference_forward(x, p):
    h1 = jnp.maximum(x @ p["w1"] + p["b1"], 0.0)
    h2 = jnp.maximum(h1 @ p["w2"] + p["b2"], 0.0)
    return h2 @ p["w3"] + p["b3"]


if __name__ == "__main__":
    # 8x8 digits flattened to 64 features, hidden_size=10 (as in train.py),
    # 10 classes. batch=256 -> auto tb=128 (2 grid steps, both v7x TCs used).
    batch, input_size, hidden_size, num_classes = 256, 64, 10, 10

    key = jax.random.PRNGKey(0)
    k_x, k_p = jax.random.split(key)
    x = jax.random.normal(k_x, (batch, input_size), jnp.float32)
    params = init_params(k_p, input_size, hidden_size, num_classes)

    # One-time padding/cast, off the hot path.
    padded_params = jax.block_until_ready(prepare_params(params))

    out = digit_classifier_forward(x, padded_params, num_classes)
    out = jax.block_until_ready(out)

    ref = reference_forward(x, params)
    assert out.shape == (batch, num_classes)
    assert jnp.allclose(out, ref, atol=1e-5, rtol=1e-5), "mismatch vs reference"

    print("KERNEL_OK")
</pallas_src>

<mosaic_0001>
module attributes {stable_mosaic.version = 11 : i64} {
  func.func @mlp_kernel(%arg0: i32, %arg1: memref<128x64xf32, #tpu.memory_space<vmem>>, %arg2: memref<64x128xf32, #tpu.memory_space<vmem>>, %arg3: memref<1x128xf32, #tpu.memory_space<vmem>>, %arg4: memref<128x128xf32, #tpu.memory_space<vmem>>, %arg5: memref<1x128xf32, #tpu.memory_space<vmem>>, %arg6: memref<128x128xf32, #tpu.memory_space<vmem>>, %arg7: memref<1x128xf32, #tpu.memory_space<vmem>>, %arg8: memref<128x128xf32, #tpu.memory_space<vmem>>) attributes {dimension_semantics = [#tpu.dimension_semantics<parallel>], iteration_bounds = array<i64: 2>, scalar_prefetch = 0 : i64, scratch_operands = 0 : i64, tpu.core_type = #tpu.core_type<tc>, window_params = [{transform_indices = @transform_0, window_bounds = array<i64: 128, 64>}, {pipeline_mode = #tpu.pipeline_mode<synchronous>, transform_indices = @transform_1, window_bounds = array<i64: 64, 128>}, {pipeline_mode = #tpu.pipeline_mode<synchronous>, transform_indices = @transform_2, window_bounds = array<i64: 1, 128>}, {pipeline_mode = #tpu.pipeline_mode<synchronous>, transform_indices = @transform_3, window_bounds = array<i64: 128, 128>}, {pipeline_mode = #tpu.pipeline_mode<synchronous>, transform_indices = @transform_4, window_bounds = array<i64: 1, 128>}, {pipeline_mode = #tpu.pipeline_mode<synchronous>, transform_indices = @transform_5, window_bounds = array<i64: 128, 128>}, {pipeline_mode = #tpu.pipeline_mode<synchronous>, transform_indices = @transform_6, window_bounds = array<i64: 1, 128>}, {transform_indices = @transform_7, window_bounds = array<i64: 128, 128>}]} {
    %c0 = arith.constant 0 : index
    %c0_0 = arith.constant 0 : index
    %0 = vector.load %arg1[%c0, %c0_0] : memref<128x64xf32, #tpu.memory_space<vmem>>, vector<128x64xf32>
    %c0_1 = arith.constant 0 : index
    %c0_2 = arith.constant 0 : index
    %1 = vector.load %arg2[%c0_1, %c0_2] : memref<64x128xf32, #tpu.memory_space<vmem>>, vector<64x128xf32>
    %cst = arith.constant dense<0.000000e+00> : vector<128x128xf32>
    %2 = tpu.matmul %0, %1, %cst {dimension_numbers = #tpu.dot_dimension_numbers<[1], [0], [0], [1], [0, 0, 1, 1], [], []>} : vector<128x64xf32>, vector<64x128xf32>, vector<128x128xf32> -> vector<128x128xf32>
    %c0_3 = arith.constant 0 : index
    %c0_4 = arith.constant 0 : index
    %3 = vector.load %arg3[%c0_3, %c0_4] : memref<1x128xf32, #tpu.memory_space<vmem>>, vector<1x128xf32>
    %4 = vector.broadcast %3 : vector<1x128xf32> to vector<128x128xf32>
    %5 = arith.addf %2, %4 : vector<128x128xf32>
    %cst_5 = arith.constant 0.000000e+00 : f32
    %6 = vector.broadcast %cst_5 : f32 to vector<128x128xf32>
    %7 = arith.maximumf %5, %6 : vector<128x128xf32>
    %c0_6 = arith.constant 0 : index
    %c0_7 = arith.constant 0 : index
    %8 = vector.load %arg4[%c0_6, %c0_7] : memref<128x128xf32, #tpu.memory_space<vmem>>, vector<128x128xf32>
    %cst_8 = arith.constant dense<0.000000e+00> : vector<128x128xf32>
    %9 = tpu.matmul %7, %8, %cst_8 {dimension_numbers = #tpu.dot_dimension_numbers<[1], [0], [0], [1], [0, 0, 1, 1], [], []>} : vector<128x128xf32>, vector<128x128xf32>, vector<128x128xf32> -> vector<128x128xf32>
    %c0_9 = arith.constant 0 : index
    %c0_10 = arith.constant 0 : index
    %10 = vector.load %arg5[%c0_9, %c0_10] : memref<1x128xf32, #tpu.memory_space<vmem>>, vector<1x128xf32>
    %11 = vector.broadcast %10 : vector<1x128xf32> to vector<128x128xf32>
    %12 = arith.addf %9, %11 : vector<128x128xf32>
    %cst_11 = arith.constant 0.000000e+00 : f32
    %13 = vector.broadcast %cst_11 : f32 to vector<128x128xf32>
    %14 = arith.maximumf %12, %13 : vector<128x128xf32>
    %c0_12 = arith.constant 0 : index
    %c0_13 = arith.constant 0 : index
    %15 = vector.load %arg6[%c0_12, %c0_13] : memref<128x128xf32, #tpu.memory_space<vmem>>, vector<128x128xf32>
    %cst_14 = arith.constant dense<0.000000e+00> : vector<128x128xf32>
    %16 = tpu.matmul %14, %15, %cst_14 {dimension_numbers = #tpu.dot_dimension_numbers<[1], [0], [0], [1], [0, 0, 1, 1], [], []>} : vector<128x128xf32>, vector<128x128xf32>, vector<128x128xf32> -> vector<128x128xf32>
    %c0_15 = arith.constant 0 : index
    %c0_16 = arith.constant 0 : index
    %17 = vector.load %arg7[%c0_15, %c0_16] : memref<1x128xf32, #tpu.memory_space<vmem>>, vector<1x128xf32>
    %18 = vector.broadcast %17 : vector<1x128xf32> to vector<128x128xf32>
    %19 = arith.addf %16, %18 : vector<128x128xf32>
    %c0_17 = arith.constant 0 : index
    %c0_18 = arith.constant 0 : index
    %20 = vector.load %arg8[%c0_17, %c0_18] : memref<128x128xf32, #tpu.memory_space<vmem>>, vector<128x128xf32>
    tpu.vector_store %arg8[%c0_17, %c0_18], %19 {strides = array<i32>} : memref<128x128xf32, #tpu.memory_space<vmem>>, vector<128x128xf32>,
    return
  }
  func.func @transform_0(%arg0: i32) -> (i32, i32) {
    %c0_i32 = arith.constant 0 : i32
    %c0_i32_0 = arith.constant 0 : i32
    return %arg0, %c0_i32 : i32, i32
  }
  func.func @transform_1(%arg0: i32) -> (i32, i32) {
    %c0_i32 = arith.constant 0 : i32
    %c0_i32_0 = arith.constant 0 : i32
    %c0_i32_1 = arith.constant 0 : i32
    return %c0_i32, %c0_i32_0 : i32, i32
  }
  func.func @transform_2(%arg0: i32) -> (i32, i32) {
    %c0_i32 = arith.constant 0 : i32
    %c0_i32_0 = arith.constant 0 : i32
    %c0_i32_1 = arith.constant 0 : i32
    return %c0_i32, %c0_i32_0 : i32, i32
  }
  func.func @transform_3(%arg0: i32) -> (i32, i32) {
    %c0_i32 = arith.constant 0 : i32
    %c0_i32_0 = arith.constant 0 : i32
    %c0_i32_1 = arith.constant 0 : i32
    return %c0_i32, %c0_i32_0 : i32, i32
  }
  func.func @transform_4(%arg0: i32) -> (i32, i32) {
    %c0_i32 = arith.constant 0 : i32
    %c0_i32_0 = arith.constant 0 : i32
    %c0_i32_1 = arith.constant 0 : i32
    return %c0_i32, %c0_i32_0 : i32, i32
  }
  func.func @transform_5(%arg0: i32) -> (i32, i32) {
    %c0_i32 = arith.constant 0 : i32
    %c0_i32_0 = arith.constant 0 : i32
    %c0_i32_1 = arith.constant 0 : i32
    return %c0_i32, %c0_i32_0 : i32, i32
  }
  func.func @transform_6(%arg0: i32) -> (i32, i32) {
    %c0_i32 = arith.constant 0 : i32
    %c0_i32_0 = arith.constant 0 : i32
    %c0_i32_1 = arith.constant 0 : i32
    return %c0_i32, %c0_i32_0 : i32, i32
  }
  func.func @transform_7(%arg0: i32) -> (i32, i32) {
    %c0_i32 = arith.constant 0 : i32
    %c0_i32_0 = arith.constant 0 : i32
    return %arg0, %c0_i32 : i32, i32
  }
}

</mosaic_0001>

<bundles_post_ra>
// kernel: digit_classifier_forward.1
= control target key start
LH: loop header
LB: loop body
LE: loop exit
PB: predicated region body
PF: predicated region fallthrough
CT: control target
= control target key end

     0   :  { %s816_s24 = smov 0   ;;  %s1039_s0 = inlined_call_operand.vmem [shape: f32[256,64], index: 0, kind: input, shape index: {}]   ;;  %s1040_s1 = inlined_call_operand.vmem [shape: f32[64,128], index: 1, kind: input, shape index: {}]   ;;  %s1041_s2 = inlined_call_operand.vmem [shape: f32[1,128], index: 2, kind: input, shape index: {}]   ;;  %s1042_s3 = inlined_call_operand.vmem [shape: f32[128,128], index: 3, kind: input, shape index: {}]   ;;  %s1043_s4 = inlined_call_operand.vmem [shape: f32[1,128], index: 4, kind: input, shape index: {}]   ;;  %s1044_s5 = inlined_call_operand.vmem [shape: f32[128,128], index: 5, kind: input, shape index: {}]   ;;  %s1045_s6 = inlined_call_operand.vmem [shape: f32[1,128], index: 6, kind: input, shape index: {}]   ;;  %s1046_s7 = inlined_call_operand.vmem [shape: f32[256,128], index: 7, kind: output, shape index: {}]  }
   0x1 LB: > { %s698_s25 = sadd.s32 4294967295, %s774_s24   ;;  %p702_p0 = scmp.ge.s32.totalorder %s774_s24, 1  ;;  %s774_s24 = sphi %s816_s24, %s17_s24  }
   0x2   : > { %p238_p1 = scmp.lt.s32.totalorder %s774_s24, 3 }
   0x4   : > { %p239_p2 = pnand %p702_p0, %p238_p1 }
   0x5   : > { %s703_s30 = sshll.u32 (!%p239_p2), %s698_s25, 4 }
   0x6   : > { %242 = sbr.rel (%p239_p2) target bundleno = 548 (0x224), region = 48  ;;  %p271_p3 = scmp.lt.s32.totalorder (!%p239_p2), %s703_s30, 31 }
   0xb   : > { %v305_v0 = vld [vmem:[%s1040_s1 + $0x38] sm:$0xff]  ;;  %v304_v1 = vld [vmem:[%s1040_s1 + $0x30] sm:$0xff]  ;;  %v303_v2 = vld [vmem:[%s1040_s1 + $0x28] sm:$0xff]  ;;  %s1048_s30 = smov (!%p271_p3, %s703_s30), 31  ;;  %vm310_vm0 = vcmask 523264  }
   0xc   : > { %367 = vmatpush.msra.mxu0 %v305_v0  ;;  %v302_v3 = vld [vmem:[%s1040_s1 + $0x20] sm:$0xff]  ;;  %v301_v4 = vld [vmem:[%s1040_s1 + $0x18] sm:$0xff]  ;;  %s704_s14 = sshll.u32 %s1048_s30, 3  ;;  %v300_v5 = vld [vmem:[%s1040_s1 + $0x10] sm:$0xff] }
   0xd   : > { %v299_v6 = vld [vmem:[%s1040_s1 + $0x8] sm:$0xff]  ;;  %s853_s21 = scalar_lea.vmem %s1039_s0, %s704_s14  ;;  %v298_v7 = vld [vmem:[%s1040_s1] sm:$0xff]  ;;  %v455_v17 = vld [vmem:[%s1042_s3 + $0x78] sm:$0xff]  ;;  %s1018_s17 = scalar_lea.vmem %s1046_s7, %s704_s14 }
   0xe   : > { %368 = vmatpush.msra.mxu0 %v304_v1  ;;  %v282_v8 = vld [vmem:[%s853_s21] sm:$0xff]  ;;  %v283_v9 = vld [vmem:[%s853_s21 + $0x8] sm:$0xff]  ;;  %v284_v10 = vld [vmem:[%s853_s21 + $0x10] sm:$0xff]  ;;  %460 = vmatpush.msra.mxu1 %v455_v17 }
   0xf   : > { %v285_v11 = vld [vmem:[%s853_s21 + $0x18] sm:$0xff]  ;;  %v286_v12 = vld [vmem:[%s853_s21 + $0x20] sm:$0xff]  ;;  %v287_v13 = vld [vmem:[%s853_s21 + $0x28] sm:$0xff]  ;;  %725 = vmatpush.msra.mxu3 %v455_v17 }
  0x10   : > { %369 = vmatpush.msra.mxu0 %v303_v2  ;;  %v288_v14 = vld [vmem:[%s853_s21 + $0x30] sm:$0xff]  ;;  %v289_v15 = vld [vmem:[%s853_s21 + $0x38] sm:$0xff]  ;;  %v290_v16 = vld [vmem:[%s853_s21 + $0x40] sm:$0xff] }
  0x11   : > { %v454_v18 = vld [vmem:[%s1042_s3 + $0x70] sm:$0xff]  ;;  %v453_v19 = vld [vmem:[%s1042_s3 + $0x68] sm:$0xff]  ;;  %v452_v21 = vld [vmem:[%s1042_s3 + $0x60] sm:$0xff] }
  0x12   : > { %370 = vmatpush.msra.mxu0 %v302_v3  ;;  %461 = vmatpush.msra.mxu1 %v454_v18  ;;  %v291_v20 = vld [vmem:[%s853_s21 + $0x48] sm:$0xff]  ;;  %v451_v22 = vld [vmem:[%s1042_s3 + $0x58] sm:$0xff]  ;;  %v450_v23 = vld [vmem:[%s1042_s3 + $0x50] sm:$0xff] }
  0x13   : > { %726 = vmatpush.msra.mxu3 %v454_v18  ;;  %v449_v24 = vld [vmem:[%s1042_s3 + $0x48] sm:$0xff]  ;;  %v292_v25 = vld [vmem:[%s853_s21 + $0x50] sm:$0xff]  ;;  %v448_v26 = vld [vmem:[%s1042_s3 + $0x40] sm:$0xff] }
  0x14   : > { %371 = vmatpush.msra.mxu0 %v301_v4  ;;  %462 = vmatpush.msra.mxu1 %v453_v19  ;;  %v447_v27 = vld [vmem:[%s1042_s3 + $0x38] sm:$0xff]  ;;  %v446_v28 = vld [vmem:[%s1042_s3 + $0x30] sm:$0xff]  ;;  %v445_v29 = vld [vmem:[%s1042_s3 + $0x28] sm:$0xff] }
  0x15   : > { %727 = vmatpush.msra.mxu3 %v453_v19  ;;  %v293_v30 = vld [vmem:[%s853_s21 + $0x58] sm:$0xff]  ;;  %v444_v31 = vld [vmem:[%s1042_s3 + $0x20] sm:$0xff]  ;;  %v442_v33 = vld [vmem:[%s1042_s3 + $0x10] sm:$0xff] }
  0x16   : > { %372 = vmatpush.msra.mxu0 %v300_v5  ;;  %463 = vmatpush.msra.mxu1 %v452_v21  ;;  %v443_v32 = vld [vmem:[%s1042_s3 + $0x18] sm:$0xff]  ;;  %v294_v34 = vld [vmem:[%s853_s21 + $0x60] sm:$0xff]  ;;  %v441_v35 = vld [vmem:[%s1042_s3 + $0x8] sm:$0xff] }
  0x17   : > { %728 = vmatpush.msra.mxu3 %v452_v21  ;;  %v440_v36 = vld [vmem:[%s1042_s3] sm:$0xff]  ;;  %v295_v37 = vld [vmem:[%s853_s21 + $0x68] sm:$0xff]  ;;  %v296_v38 = vld [vmem:[%s853_s21 + $0x70] sm:$0xff] }
  0x18   : > { %373 = vmatpush.msra.mxu0 %v299_v6  ;;  %464 = vmatpush.msra.mxu1 %v451_v22  ;;  %v297_v39 = vld [vmem:[%s853_s21 + $0x78] sm:$0xff]  ;;  %v941_v40 = vld [vmem:[%s1041_s2] ss:$0 sm:$0xff]  ;;  %v547_v21 = vld [vmem:[%s1044_s5 + $0x30] sm:$0xff] }
  0x19   : > { %729 = vmatpush.msra.mxu3 %v451_v22  ;;  %v556_v4 = vld [vmem:[%s1044_s5 + $0x78] sm:$0xff]  ;;  %v549_v17 = vld [vmem:[%s1044_s5 + $0x40] sm:$0xff] }
  0x1a   : > { %374 = vmatpush.msra.mxu0 %v298_v7  ;;  %465 = vmatpush.msra.mxu1 %v450_v23  ;;  %v555_v7 = vld [vmem:[%s1044_s5 + $0x70] sm:$0xff]  ;;  %v548_v18 = vld [vmem:[%s1044_s5 + $0x38] sm:$0xff] }
  0x1b   : > { %707 = vmatmul.msk.f32.vlgmr.msra.gmra.mxu0 %vm310_vm0, %v282_v8  ;;  %730 = vmatpush.msra.mxu3 %v450_v23  ;;  %v546_v23 = vld [vmem:[%s1044_s5 + $0x28] sm:$0xff] }
  0x1c   : > { %466 = vmatpush.msra.mxu1 %v449_v24  ;;  %561 = vmatpush.msra.mxu2 %v556_v4 }
  0x1d   : > { %731 = vmatpush.msra.mxu3 %v449_v24  ;;  %v545_v24 = vld [vmem:[%s1044_s5 + $0x20] sm:$0xff] }
  0x1e   : > { %467 = vmatpush.msra.mxu1 %v448_v26  ;;  %562 = vmatpush.msra.mxu2 %v555_v7 }
  0x1f   : > { %732 = vmatpush.msra.mxu3 %v448_v26 }
  0x20   : > { %468 = vmatpush.msra.mxu1 %v447_v27 }
  0x21   : > { %733 = vmatpush.msra.mxu3 %v447_v27 }
  0x22   : > { %469 = vmatpush.msra.mxu1 %v446_v28 }
  0x23   : > { %708 = vmatmul.msk.f32.gmra.mxu0 %vm310_vm0, %v283_v9  ;;  %734 = vmatpush.msra.mxu3 %v446_v28  ;;  %v554_v9 = vld [vmem:[%s1044_s5 + $0x68] sm:$0xff]  ;;  %v543_v28 = vld [vmem:[%s1044_s5 + $0x10] sm:$0xff] }
  0x24   : > { %470 = vmatpush.msra.mxu1 %v445_v29  ;;  %563 = vmatpush.msra.mxu2 %v554_v9 }
  0x25   : > { %735 = vmatpush.msra.mxu3 %v445_v29 }
  0x26   : > { %471 = vmatpush.msra.mxu1 %v444_v31 }
  0x27   : > { %736 = vmatpush.msra.mxu3 %v444_v31  ;;  %v541_v31 = vld [vmem:[%s1044_s5] sm:$0xff] }
  0x28   : > { %472 = vmatpush.msra.mxu1 %v443_v32 }
  0x29   : > { %737 = vmatpush.msra.mxu3 %v443_v32 }
  0x2a   : > { %473 = vmatpush.msra.mxu1 %v442_v33 }
  0x2b   : > { %709 = vmatmul.msk.f32.gmra.mxu0 %vm310_vm0, %v284_v10  ;;  %738 = vmatpush.msra.mxu3 %v442_v33  ;;  %v553_v10 = vld [vmem:[%s1044_s5 + $0x60] sm:$0xff] }
  0x2c   : > { %474 = vmatpush.msra.mxu1 %v441_v35  ;;  %564 = vmatpush.msra.mxu2 %v553_v10 }
  0x2d   : > { %739 = vmatpush.msra.mxu3 %v441_v35 }
  0x2e   : > { %475 = vmatpush.msra.mxu1 %v440_v36 }
  0x2f   : > { %740 = vmatpush.msra.mxu3 %v440_v36 }
  0x31   : > { %741 = vmatpush.msrb.mxu3 %v556_v4 }
  0x33   : > { %710 = vmatmul.msk.f32.gmra.mxu0 %vm310_vm0, %v285_v11  ;;  %742 = vmatpush.msrb.mxu3 %v555_v7  ;;  %v552_v11 = vld [vmem:[%s1044_s5 + $0x58] sm:$0xff] }
  0x34   : > { %565 = vmatpush.msra.mxu2 %v552_v11 }
  0x35   : > { %743 = vmatpush.msrb.mxu3 %v554_v9 }
  0x37   : > { %744 = vmatpush.msrb.mxu3 %v553_v10 }
  0x39   : > { %745 = vmatpush.msrb.mxu3 %v552_v11 }
  0x3b   : > { %711 = vmatmul.msk.f32.gmra.mxu0 %vm310_vm0, %v286_v12 }
  0x43   : > { %712 = vmatmul.msk.f32.gmra.mxu0 %vm310_vm0, %v287_v13 }
  0x4b   : > { %713 = vmatmul.msk.f32.gmra.mxu0 %vm310_vm0, %v288_v14  ;;  %v551_v14 = vld [vmem:[%s1044_s5 + $0x50] sm:$0xff] }
  0x4c   : > { %566 = vmatpush.msra.mxu2 %v551_v14  ;;  %746 = vmatpush.msrb.mxu3 %v551_v14 }
  0x53   : > { %714 = vmatmul.msk.f32.gmra.mxu0 %vm310_vm0, %v289_v15 }
  0x5b   : > { %715 = vmatmul.msk.f32.gmra.mxu0 %vm310_vm0, %v290_v16  ;;  %v550_v16 = vld [vmem:[%s1044_s5 + $0x48] sm:$0xff] }
  0x5c   : > { %567 = vmatpush.msra.mxu2 %v550_v16  ;;  %747 = vmatpush.msrb.mxu3 %v550_v16 }
  0x5e   : > { %568 = vmatpush.msra.mxu2 %v549_v17  ;;  %748 = vmatpush.msrb.mxu3 %v549_v17 }
  0x60   : > { %569 = vmatpush.msra.mxu2 %v548_v18  ;;  %749 = vmatpush.msrb.mxu3 %v548_v18 }
  0x62   : > { %570 = vmatpush.msra.mxu2 %v547_v21  ;;  %750 = vmatpush.msrb.mxu3 %v547_v21 }
  0x63   : > { %716 = vmatmul.msk.f32.gmra.mxu0 %vm310_vm0, %v291_v20 }
  0x64   : > { %571 = vmatpush.msra.mxu2 %v546_v23  ;;  %751 = vmatpush.msrb.mxu3 %v546_v23 }
  0x66   : > { %572 = vmatpush.msra.mxu2 %v545_v24  ;;  %752 = vmatpush.msrb.mxu3 %v545_v24 }
  0x6b   : > { %717 = vmatmul.msk.f32.gmra.mxu0 %vm310_vm0, %v292_v25  ;;  %v544_v25 = vld [vmem:[%s1044_s5 + $0x18] sm:$0xff] }
  0x6c   : > { %573 = vmatpush.msra.mxu2 %v544_v25  ;;  %753 = vmatpush.msrb.mxu3 %v544_v25 }
  0x6e   : > { %574 = vmatpush.msra.mxu2 %v543_v28  ;;  %754 = vmatpush.msrb.mxu3 %v543_v28 }
  0x73   : > { %718 = vmatmul.msk.f32.gmra.mxu0 %vm310_vm0, %v293_v30  ;;  %v542_v30 = vld [vmem:[%s1044_s5 + $0x8] sm:$0xff] }
  0x74   : > { %575 = vmatpush.msra.mxu2 %v542_v30  ;;  %755 = vmatpush.msrb.mxu3 %v542_v30 }
  0x76   : > { %576 = vmatpush.msra.mxu2 %v541_v31  ;;  %756 = vmatpush.msrb.mxu3 %v541_v31 }
  0x7b   : > { %719 = vmatmul.msk.f32.gmra.mxu0 %vm310_vm0, %v294_v34 }
  0x83   : > { %720 = vmatmul.msk.f32.gmra.mxu0 %vm310_vm0, %v295_v37 }
  0x8b   : > { %721 = vmatmul.msk.f32.gmra.mxu0 %vm310_vm0, %v296_v38 }
  0x93   : > { %722 = vmatmul.msk.f32.gmra.mxu0 %vm310_vm0, %v297_v39 }
  0x98   : > { %v376_v41 = vpop.f32.mrf.mxu0 }
  0x99   : > { %v377_v42 = vadd.f32 %v941_v40, %v376_v41 }
  0x9b   : > { %v424_v43 = vmax.f32 %v377_v42, 0.0  ;;  %v766_v42 = vld [vmem:[%s1043_s4] ss:$0 sm:$0xff] }
  0x9d   : > { %476 = vmatmul.f32.vlgmr.msra.gmra.mxu1 %v424_v43 }
  0xa0   : > { %v379_v44 = vpop.f32.mrf.mxu0 }
  0xa1   : > { %v380_v45 = vadd.f32 %v941_v40, %v379_v44 }
  0xa3   : > { %v425_v46 = vmax.f32 %v380_v45, 0.0 }
  0xa5   : > { %479 = vmatmul.f32.gmra.mxu1 %v425_v46 }
  0xa8   : > { %v382_v47 = vpop.f32.mrf.mxu0 }
  0xa9   : > { %v383_v48 = vadd.f32 %v941_v40, %v382_v47 }
  0xab   : > { %v426_v49 = vmax.f32 %v383_v48, 0.0 }
  0xad   : > { %482 = vmatmul.f32.gmra.mxu1 %v426_v49 }
  0xb0   : > { %v385_v50 = vpop.f32.mrf.mxu0 }
  0xb1   : > { %v386_v51 = vadd.f32 %v941_v40, %v385_v50 }
  0xb3   : > { %v427_v52 = vmax.f32 %v386_v51, 0.0 }
  0xb5   : > { %485 = vmatmul.f32.gmra.mxu1 %v427_v52 }
  0xb8   : > { %v388_v53 = vpop.f32.mrf.mxu0 }
  0xb9   : > { %v389_v54 = vadd.f32 %v941_v40, %v388_v53 }
  0xbb   : > { %v428_v55 = vmax.f32 %v389_v54, 0.0 }
  0xbd   : > { %488 = vmatmul.f32.gmra.mxu1 %v428_v55 }
  0xc0   : > { %v391_v56 = vpop.f32.mrf.mxu0 }
  0xc1   : > { %v392_v57 = vadd.f32 %v941_v40, %v391_v56 }
  0xc3   : > { %v429_v58 = vmax.f32 %v392_v57, 0.0 }
  0xc5   : > { %491 = vmatmul.f32.gmra.mxu1 %v429_v58 }
  0xc8   : > { %v394_v59 = vpop.f32.mrf.mxu0 }
  0xc9   : > { %v395_v60 = vadd.f32 %v941_v40, %v394_v59 }
  0xcb   : > { %v430_v61 = vmax.f32 %v395_v60, 0.0 }
  0xcd   : > { %494 = vmatmul.f32.gmra.mxu1 %v430_v61 }
  0xd0   : > { %v397_v62 = vpop.f32.mrf.mxu0 }
  0xd1   : > { %v398_v63 = vadd.f32 %v941_v40, %v397_v62 }
  0xd3   : > { %v431_v0 = vmax.f32 %v398_v63, 0.0 }
  0xd5   : > { %497 = vmatmul.f32.gmra.mxu1 %v431_v0 }
  0xd8   : > { %v400_v1 = vpop.f32.mrf.mxu0 }
  0xd9   : > { %v401_v2 = vadd.f32 %v941_v40, %v400_v1 }
  0xdb   : > { %v432_v3 = vmax.f32 %v401_v2, 0.0 }
  0xdd   : > { %500 = vmatmul.f32.gmra.mxu1 %v432_v3 }
  0xe0   : > { %v403_v5 = vpop.f32.mrf.mxu0 }
  0xe1   : > { %v404_v6 = vadd.f32 %v941_v40, %v403_v5 }
  0xe3   : > { %v433_v8 = vmax.f32 %v404_v6, 0.0 }
  0xe5   : > { %503 = vmatmul.f32.gmra.mxu1 %v433_v8 }
  0xe8   : > { %v406_v12 = vpop.f32.mrf.mxu0 }
  0xe9   : > { %v407_v13 = vadd.f32 %v941_v40, %v406_v12 }
  0xeb   : > { %v434_v15 = vmax.f32 %v407_v13, 0.0 }
  0xed   : > { %506 = vmatmul.f32.gmra.mxu1 %v434_v15 }
  0xf0   : > { %v409_v19 = vpop.f32.mrf.mxu0 }
  0xf1   : > { %v410_v20 = vadd.f32 %v941_v40, %v409_v19 }
  0xf3   : > { %v435_v22 = vmax.f32 %v410_v20, 0.0 }
  0xf5   : > { %509 = vmatmul.f32.gmra.mxu1 %v435_v22 }
  0xf8   : > { %v412_v26 = vpop.f32.mrf.mxu0 }
  0xf9   : > { %v413_v27 = vadd.f32 %v941_v40, %v412_v26  ;;  %v767_v26 = vld [vmem:[%s1045_s6] ss:$0 sm:$0xff] }
  0xfb   : > { %v436_v29 = vmax.f32 %v413_v27, 0.0 }
  0xfd   : > { %512 = vmatmul.f32.vlgmr.msra.gmra.mxu3 %v436_v29 }
 0x100   : > { %v415_v32 = vpop.f32.mrf.mxu0 }
 0x101   : > { %v416_v33 = vadd.f32 %v941_v40, %v415_v32 }
 0x103   : > { %v437_v34 = vmax.f32 %v416_v33, 0.0 }
 0x105   : > { %515 = vmatmul.f32.gmra.mxu3 %v437_v34 }
 0x108   : > { %v418_v35 = vpop.f32.mrf.mxu0 }
 0x109   : > { %v419_v36 = vadd.f32 %v941_v40, %v418_v35 }
 0x10b   : > { %v438_v37 = vmax.f32 %v419_v36, 0.0 }
 0x10d   : > { %518 = vmatmul.f32.gmra.mxu3 %v438_v37 }
 0x110   : > { %v421_v38 = vpop.f32.mrf.mxu0 }
 0x111   : > { %v422_v39 = vadd.f32 %v941_v40, %v421_v38 }
 0x113   : > { %v439_v41 = vmax.f32 %v422_v39, 0.0 }
 0x115   : > { %521 = vmatmul.f32.gmra.mxu3 %v439_v41 }
 0x11a   : > { %v477_v43 = vpop.f32.mrf.mxu1 }
 0x11b   : > { %v478_v44 = vadd.f32 %v766_v42, %v477_v43 }
 0x11d   : > { %v525_v45 = vmax.f32 %v478_v44, 0.0 }
 0x11f   : > { %577 = vmatmul.f32.vlgmr.msra.gmra.mxu2 %v525_v45 }
 0x122   : > { %v480_v46 = vpop.f32.mrf.mxu1 }
 0x123   : > { %v481_v47 = vadd.f32 %v766_v42, %v480_v46 }
 0x125   : > { %v526_v48 = vmax.f32 %v481_v47, 0.0 }
 0x127   : > { %580 = vmatmul.f32.gmra.mxu2 %v526_v48 }
 0x12a   : > { %v483_v49 = vpop.f32.mrf.mxu1 }
 0x12b   : > { %v484_v50 = vadd.f32 %v766_v42, %v483_v49 }
 0x12d   : > { %v527_v51 = vmax.f32 %v484_v50, 0.0 }
 0x12f   : > { %583 = vmatmul.f32.gmra.mxu2 %v527_v51 }
 0x132   : > { %v486_v52 = vpop.f32.mrf.mxu1 }
 0x133   : > { %v487_v40 = vadd.f32 %v766_v42, %v486_v52 }
 0x135   : > { %v528_v53 = vmax.f32 %v487_v40, 0.0 }
 0x137   : > { %586 = vmatmul.f32.gmra.mxu2 %v528_v53 }
 0x13a   : > { %v489_v54 = vpop.f32.mrf.mxu1 }
 0x13b   : > { %v490_v55 = vadd.f32 %v766_v42, %v489_v54 }
 0x13d   : > { %v529_v56 = vmax.f32 %v490_v55, 0.0 }
 0x13f   : > { %589 = vmatmul.f32.gmra.mxu2 %v529_v56 }
 0x142   : > { %v492_v57 = vpop.f32.mrf.mxu1 }
 0x143   : > { %v493_v58 = vadd.f32 %v766_v42, %v492_v57 }
 0x145   : > { %v530_v59 = vmax.f32 %v493_v58, 0.0 }
 0x147   : > { %592 = vmatmul.f32.gmra.mxu2 %v530_v59 }
 0x14a   : > { %v495_v60 = vpop.f32.mrf.mxu1 }
 0x14b   : > { %v496_v61 = vadd.f32 %v766_v42, %v495_v60 }
 0x14d   : > { %v531_v62 = vmax.f32 %v496_v61, 0.0 }
 0x14f   : > { %595 = vmatmul.f32.gmra.mxu2 %v531_v62 }
 0x152   : > { %v498_v63 = vpop.f32.mrf.mxu1 }
 0x153   : > { %v499_v0 = vadd.f32 %v766_v42, %v498_v63 }
 0x155   : > { %v532_v1 = vmax.f32 %v499_v0, 0.0 }
 0x157   : > { %598 = vmatmul.f32.gmra.mxu2 %v532_v1 }
 0x15a   : > { %v501_v2 = vpop.f32.mrf.mxu1 }
 0x15b   : > { %v502_v3 = vadd.f32 %v766_v42, %v501_v2 }
 0x15d   : > { %v533_v4 = vmax.f32 %v502_v3, 0.0 }
 0x15f   : > { %601 = vmatmul.f32.gmra.mxu2 %v533_v4 }
 0x162   : > { %v504_v5 = vpop.f32.mrf.mxu1 }
 0x163   : > { %v505_v6 = vadd.f32 %v766_v42, %v504_v5 }
 0x165   : > { %v534_v7 = vmax.f32 %v505_v6, 0.0 }
 0x167   : > { %604 = vmatmul.f32.gmra.mxu2 %v534_v7 }
 0x16a   : > { %v507_v8 = vpop.f32.mrf.mxu1 }
 0x16b   : > { %v508_v9 = vadd.f32 %v766_v42, %v507_v8 }
 0x16d   : > { %v535_v10 = vmax.f32 %v508_v9, 0.0 }
 0x16f   : > { %607 = vmatmul.f32.gmra.mxu2 %v535_v10 }
 0x172   : > { %v510_v11 = vpop.f32.mrf.mxu1 }
 0x173   : > { %v511_v12 = vadd.f32 %v766_v42, %v510_v11 }
 0x175   : > { %v536_v13 = vmax.f32 %v511_v12, 0.0 }
 0x177   : > { %610 = vmatmul.f32.gmra.mxu2 %v536_v13 }
 0x180   : > { %v513_v14 = vpop.f32.mrf.mxu3 }
 0x181   : > { %v514_v15 = vadd.f32 %v766_v42, %v513_v14 }
 0x183   : > { %v537_v16 = vmax.f32 %v514_v15, 0.0 }
 0x185   : > { %613 = vmatmul.f32.vlgmr.msrb.gmra.mxu3 %v537_v16 }
 0x188   : > { %v516_v17 = vpop.f32.mrf.mxu3 }
 0x189   : > { %v517_v18 = vadd.f32 %v766_v42, %v516_v17 }
 0x18b   : > { %v538_v19 = vmax.f32 %v517_v18, 0.0 }
 0x18d   : > { %616 = vmatmul.f32.gmra.mxu3 %v538_v19 }
 0x190   : > { %v519_v20 = vpop.f32.mrf.mxu3 }
 0x191   : > { %v520_v21 = vadd.f32 %v766_v42, %v519_v20 }
 0x193   : > { %v539_v22 = vmax.f32 %v520_v21, 0.0 }
 0x195   : > { %619 = vmatmul.f32.gmra.mxu3 %v539_v22 }
 0x198   : > { %v522_v23 = vpop.f32.mrf.mxu3 }
 0x199   : > { %v523_v24 = vadd.f32 %v766_v42, %v522_v23 }
 0x19b   : > { %v540_v25 = vmax.f32 %v523_v24, 0.0 }
 0x19d   : > { %622 = vmatmul.f32.gmra.mxu3 %v540_v25 }
 0x1a2   : > { %v578_v27 = vpop.f32.mrf.mxu2 }
 0x1a3   : > { %v579_v28 = vadd.f32 %v767_v26, %v578_v27 }
 0x1a5   : > { %626 = vst [vmem:[%s1018_s17] sm:$0xff] %v579_v28 }
 0x1aa   : > { %v581_v29 = vpop.f32.mrf.mxu2 }
 0x1ab   : > { %v582_v30 = vadd.f32 %v767_v26, %v581_v29 }
 0x1ad   : > { %627 = vst [vmem:[%s1018_s17 + $0x8] sm:$0xff] %v582_v30 }
 0x1b2   : > { %v584_v31 = vpop.f32.mrf.mxu2 }
 0x1b3   : > { %v585_v32 = vadd.f32 %v767_v26, %v584_v31 }
 0x1b5   : > { %628 = vst [vmem:[%s1018_s17 + $0x10] sm:$0xff] %v585_v32 }
 0x1ba   : > { %v587_v33 = vpop.f32.mrf.mxu2 }
 0x1bb   : > { %v588_v34 = vadd.f32 %v767_v26, %v587_v33 }
 0x1bd   : > { %629 = vst [vmem:[%s1018_s17 + $0x18] sm:$0xff] %v588_v34 }
 0x1c2   : > { %v590_v35 = vpop.f32.mrf.mxu2 }
 0x1c3   : > { %v591_v36 = vadd.f32 %v767_v26, %v590_v35 }
 0x1c5   : > { %630 = vst [vmem:[%s1018_s17 + $0x20] sm:$0xff] %v591_v36 }
 0x1ca   : > { %v593_v37 = vpop.f32.mrf.mxu2 }
 0x1cb   : > { %v594_v38 = vadd.f32 %v767_v26, %v593_v37 }
 0x1cd   : > { %631 = vst [vmem:[%s1018_s17 + $0x28] sm:$0xff] %v594_v38 }
 0x1d2   : > { %v596_v39 = vpop.f32.mrf.mxu2 }
 0x1d3   : > { %v597_v41 = vadd.f32 %v767_v26, %v596_v39 }
 0x1d5   : > { %632 = vst [vmem:[%s1018_s17 + $0x30] sm:$0xff] %v597_v41 }
 0x1da   : > { %v599_v42 = vpop.f32.mrf.mxu2 }
 0x1db   : > { %v600_v43 = vadd.f32 %v767_v26, %v599_v42 }
 0x1dd   : > { %633 = vst [vmem:[%s1018_s17 + $0x38] sm:$0xff] %v600_v43 }
 0x1e2   : > { %v602_v44 = vpop.f32.mrf.mxu2 }
 0x1e3   : > { %v603_v45 = vadd.f32 %v767_v26, %v602_v44 }
 0x1e5   : > { %634 = vst [vmem:[%s1018_s17 + $0x40] sm:$0xff] %v603_v45 }
 0x1ea   : > { %v605_v46 = vpop.f32.mrf.mxu2 }
 0x1eb   : > { %v606_v47 = vadd.f32 %v767_v26, %v605_v46 }
 0x1ed   : > { %635 = vst [vmem:[%s1018_s17 + $0x48] sm:$0xff] %v606_v47 }
 0x1f2   : > { %v608_v48 = vpop.f32.mrf.mxu2 }
 0x1f3   : > { %v609_v49 = vadd.f32 %v767_v26, %v608_v48 }
 0x1f5   : > { %636 = vst [vmem:[%s1018_s17 + $0x50] sm:$0xff] %v609_v49 }
 0x1fa   : > { %v611_v50 = vpop.f32.mrf.mxu2 }
 0x1fb   : > { %v612_v51 = vadd.f32 %v767_v26, %v611_v50 }
 0x1fd   : > { %637 = vst [vmem:[%s1018_s17 + $0x58] sm:$0xff] %v612_v51 }
 0x208   : > { %v614_v52 = vpop.f32.mrf.mxu3 }
 0x209   : > { %v615_v40 = vadd.f32 %v767_v26, %v614_v52 }
 0x20b   : > { %638 = vst [vmem:[%s1018_s17 + $0x60] sm:$0xff] %v615_v40 }
 0x210   : > { %v617_v53 = vpop.f32.mrf.mxu3 }
 0x211   : > { %v618_v54 = vadd.f32 %v767_v26, %v617_v53 }
 0x213   : > { %639 = vst [vmem:[%s1018_s17 + $0x68] sm:$0xff] %v618_v54 }
 0x218   : > { %v620_v55 = vpop.f32.mrf.mxu3 }
 0x219   : > { %v621_v56 = vadd.f32 %v767_v26, %v620_v55 }
 0x21b   : > { %640 = vst [vmem:[%s1018_s17 + $0x70] sm:$0xff] %v621_v56 }
 0x220   : > { %v623_v57 = vpop.f32.mrf.mxu3 }
 0x221   : > { %v624_v58 = vadd.f32 %v767_v26, %v623_v57 }
 0x223   : > { %641 = vst [vmem:[%s1018_s17 + $0x78] sm:$0xff] %v624_v58 }
 0x224 PF: > { %s17_s24 = sadd.s32 1, %s774_s24  }
 0x225   : > { %p14_p4 = scmp.ge.s32.totalorder %s17_s24, 4  }
 0x227   :  { %16 = sbr.rel (!%p14_p4) target bundleno = 1 (0x1), region = 78 }

</bundles_post_ra>
